<compile_context>
chip_gen: v7x
topology: tpu7x:2x2x1
jax: 0.10.0
libtpu: 0.0.40
codegen_flags: <defaults>
</compile_context>

<pallas_src>
import jax
import jax.numpy as jnp
from jax.experimental import pallas as pl
from jax.experimental.pallas import tpu as pltpu


def _round_up(x: int, m: int) -> int:
    return ((x + m - 1) // m) * m


def _cdiv(a: int, b: int) -> int:
    return -(-a // b)


def _vmem_budget_bytes() -> int:
    """Per-core VMEM budget: generation-aware, with headroom for the compiler."""
    cap = 128 * 1024 * 1024
    try:
        cap = int(getattr(pltpu.get_tpu_info(), "vmem_capacity_bytes", cap))
    except Exception:
        pass
    if cap <= 64 * 1024 * 1024:          # v7x: 64 MiB per TensorCore
        return 48 * 1024 * 1024
    return 96 * 1024 * 1024              # v5e / v6e: 128 MiB physical


def _cls_kernel(x_ref, w1_ref, b1_ref, w2_ref, b2_ref, h_ref, o_ref):
    # Layer 1 (bottleneck): run once per batch tile, on the first out_dim tile
    # only.  The h output block's index_map is constant across the out_dim
    # axis, so the block stays VMEM-resident and is reused by every j tile.
    @pl.when(pl.program_id(1) == 0)
    def _():
        h = jnp.dot(x_ref[...], w1_ref[...],
                    preferred_element_type=jnp.float32) + b1_ref[...]
        h_ref[...] = h.astype(h_ref.dtype)

    # Layer 2 (fc): every out_dim tile consumes the resident bottleneck.
    o = jnp.dot(h_ref[...], w2_ref[...],
                preferred_element_type=jnp.float32) + b2_ref[...]
    o_ref[...] = o.astype(o_ref.dtype)


def prepare_cls_params(w1, b1, w2, b2, *, tn_cap=None):
    """Pad + lay out the weights ONCE (call at init / parameter-load time).

    w1: (in_dim, bn_dim)   b1: (bn_dim,) or (1, bn_dim)
    w2: (bn_dim, out_dim)  b2: (out_dim,) or (1, out_dim)
    Weights are stored pre-transposed vs. nn.Linear so each layer is x @ W + b.
    """
    in_dim, bn_dim = w1.shape
    out_dim = w2.shape[1]
    w_itm = jnp.dtype(w2.dtype).itemsize
    budget = _vmem_budget_bytes()

    in_p = _round_up(in_dim, 128)
    bn_p = _round_up(bn_dim, 128)
    out_128 = _round_up(out_dim, 128)

    # out_dim tile: large (amortizes ~0.35 us per grid step), lane-dense, and
    # chosen so out_p = n_o * TN over-pads out_dim by < 128 lanes per tile.
    if tn_cap is None:
        tn_cap = 8192 if w_itm <= 2 else 4096
    # Keep the (double-buffered) W2 tile to <= ~1/3 of the budget so the batch
    # tile still has room.
    while 2 * bn_p * tn_cap * w_itm > budget // 3 and tn_cap > 512:
        tn_cap //= 2
    tn_cap = max(128, _round_up(tn_cap, 128))
    n_o = _cdiv(out_128, tn_cap)
    TN = 128 * _cdiv(out_128 // 128, n_o)
    out_p = TN * n_o

    # Zero padding preserves the math exactly (padded rows/cols contribute 0).
    w1p = jnp.zeros((in_p, bn_p), w1.dtype).at[:in_dim, :bn_dim].set(w1)
    b1p = jnp.zeros((1, bn_p), b1.dtype).at[:, :bn_dim].set(
        jnp.reshape(b1, (1, bn_dim)))
    w2p = jnp.zeros((bn_p, out_p), w2.dtype).at[:bn_dim, :out_dim].set(w2)
    b2p = jnp.zeros((1, out_p), b2.dtype).at[:, :out_dim].set(
        jnp.reshape(b2, (1, out_dim)))

    return dict(w1p=w1p, b1p=b1p, w2p=w2p, b2p=b2p,
                in_dim=in_dim, bn_dim=bn_dim, out_dim=out_dim,
                in_p=in_p, bn_p=bn_p, out_p=out_p, TN=TN,
                vmem_budget=budget)


def cls_forward(x, params, *, tm_cap=None):
    """Returns [x, bottleneck(x), fc(bottleneck(x))], matching the PyTorch module."""
    B, in_dim = x.shape
    assert in_dim == params["in_dim"], "x feature dim mismatch"
    dtype = x.dtype
    itm = jnp.dtype(dtype).itemsize
    w_itm = jnp.dtype(params["w2p"].dtype).itemsize

    in_p, bn_p = params["in_p"], params["bn_p"]
    out_p, TN = params["out_p"], params["TN"]
    bn_dim, out_dim = params["bn_dim"], params["out_dim"]
    budget = params["vmem_budget"]
    n_o = out_p // TN

    # ---- batch tile: big enough to amortize W2 re-streaming, small enough to
    #      fit the VMEM budget, and chosen so B pads by < 8 rows per tile. ----
    if tm_cap is None:
        tm_cap = 1024 if itm <= 2 else 512
    fixed = (2 * in_p * bn_p + 2 * bn_p + 2 * bn_p * TN + 2 * TN) * w_itm
    per_row = (2 * in_p + 2 * bn_p + 2 * TN) * itm       # x + h + o, double-buffered
    avail_rows = max(8, (budget - fixed) // max(per_row, 1))
    tm_cap = max(8, min(int(tm_cap), (int(avail_rows) // 8) * 8))

    n_b = _cdiv(B, tm_cap)
    TM = _round_up(_cdiv(B, n_b), 8)
    B_p = TM * n_b

    # Only x is padded per call; the weights were padded once in prepare.
    xp = jnp.zeros((B_p, in_p), dtype).at[:B, :in_dim].set(x)

    grid = (n_b, n_o)

    # Advisory cost estimate for the XLA scheduler.
    flops = 2 * B_p * in_p * bn_p + 2 * B_p * bn_p * out_p
    bytes_accessed = int(
        xp.size * itm
        + (in_p * bn_p + bn_p) * w_itm                     # W1 / b1 (resident)
        + (bn_p * out_p + out_p) * w_itm * n_b             # W2 / b2 streamed per batch tile
        + (B_p * bn_p + B_p * out_p) * itm)                # outputs

    h_p, o_p = pl.pallas_call(
        _cls_kernel,
        out_shape=(
            jax.ShapeDtypeStruct((B_p, bn_p), dtype),
            jax.ShapeDtypeStruct((B_p, out_p), dtype),
        ),
        grid_spec=pltpu.PrefetchScalarGridSpec(
            num_scalar_prefetch=0,
            grid=grid,
            in_specs=[
                pl.BlockSpec((TM, in_p), lambda i, j: (i, 0)),     # x tile
                pl.BlockSpec((in_p, bn_p), lambda i, j: (0, 0)),   # W1 (resident)
                pl.BlockSpec((1, bn_p), lambda i, j: (0, 0)),      # b1 (resident)
                pl.BlockSpec((bn_p, TN), lambda i, j: (0, j)),     # W2 tile
                pl.BlockSpec((1, TN), lambda i, j: (0, j)),        # b2 tile
            ],
            out_specs=(
                pl.BlockSpec((TM, bn_p), lambda i, j: (i, 0)),     # h (revisited over j)
                pl.BlockSpec((TM, TN), lambda i, j: (i, j)),       # o
            ),
        ),
        compiler_params=pltpu.CompilerParams(
            dimension_semantics=("parallel", "arbitrary"),
            vmem_limit_bytes=int(budget),
        ),
        cost_estimate=pl.CostEstimate(
            flops=int(flops), transcendentals=0, bytes_accessed=bytes_accessed),
    )(xp, params["w1p"], params["b1p"], params["w2p"], params["b2p"])

    return [x, h_p[:B, :bn_dim], o_p[:B, :out_dim]]


def init_cls_params(key, in_dim, out_dim, bottle_neck_dim=256, dtype=jnp.float32):
    """Deterministic synthetic init (shapes match nn.Linear; stored transposed)."""
    k1, k2, k3, k4 = jax.random.split(key, 4)
    s1 = 1.0 / jnp.sqrt(in_dim)
    s2 = 1.0 / jnp.sqrt(bottle_neck_dim)
    w1 = jax.random.uniform(k1, (in_dim, bottle_neck_dim), dtype, -s1, s1)
    b1 = jax.random.uniform(k2, (1, bottle_neck_dim), dtype, -s1, s1)
    w2 = jax.random.uniform(k3, (bottle_neck_dim, out_dim), dtype, -s2, s2)
    b2 = jax.random.uniform(k4, (1, out_dim), dtype, -s2, s2)
    return w1, b1, w2, b2


if __name__ == "__main__":
    def run_case(case_key, B, in_dim, bn_dim, out_dim, tm_cap=None, tn_cap=None):
        kx, kp = jax.random.split(case_key)
        x = jax.random.normal(kx, (B, in_dim), jnp.float32)
        w1, b1, w2, b2 = init_cls_params(kp, in_dim, out_dim, bottle_neck_dim=bn_dim)
        params = prepare_cls_params(w1, b1, w2, b2, tn_cap=tn_cap)   # pad once
        outs = jax.block_until_ready(cls_forward(x, params, tm_cap=tm_cap))
        h_ref = x @ w1 + b1
        o_ref = h_ref @ w2 + b2
        assert outs[0].shape == (B, in_dim)
        assert outs[1].shape == (B, bn_dim)
        assert outs[2].shape == (B, out_dim)
        assert jnp.allclose(outs[1], h_ref, atol=1e-4, rtol=1e-4)
        assert jnp.allclose(outs[2], o_ref, atol=1e-4, rtol=1e-4)

    key = jax.random.PRNGKey(0)
    k1, k2 = jax.random.split(key)

    # Small single-tile case (grid = (1, 1)).
    run_case(k1, B=8, in_dim=32, bn_dim=64, out_dim=16)

    # Ragged, multi-tile case: tile-cap overrides force grid = (3, 3) to
    # exercise the revisited-h block, batch tiling, and padding/slicing paths.
    run_case(k2, B=20, in_dim=48, bn_dim=96, out_dim=300, tm_cap=8, tn_cap=128)

    print("KERNEL_OK")
</pallas_src>

<mosaic_0001>
module attributes {stable_mosaic.version = 11 : i64} {
  func.func @_cls_kernel(%arg0: i32, %arg1: i32, %arg2: memref<8x128xf32, #tpu.memory_space<vmem>>, %arg3: memref<128x128xf32, #tpu.memory_space<vmem>>, %arg4: memref<1x128xf32, #tpu.memory_space<vmem>>, %arg5: memref<128x128xf32, #tpu.memory_space<vmem>>, %arg6: memref<1x128xf32, #tpu.memory_space<vmem>>, %arg7: memref<8x128xf32, #tpu.memory_space<vmem>>, %arg8: memref<8x128xf32, #tpu.memory_space<vmem>>) attributes {dimension_semantics = [#tpu.dimension_semantics<parallel>, #tpu.dimension_semantics<arbitrary>], iteration_bounds = array<i64: 1, 1>, scalar_prefetch = 0 : i64, scratch_operands = 0 : i64, tpu.core_type = #tpu.core_type<tc>, window_params = [{transform_indices = @transform_0, window_bounds = array<i64: 8, 128>}, {pipeline_mode = #tpu.pipeline_mode<synchronous>, transform_indices = @transform_1, window_bounds = array<i64: 128, 128>}, {pipeline_mode = #tpu.pipeline_mode<synchronous>, transform_indices = @transform_2, window_bounds = array<i64: 1, 128>}, {transform_indices = @transform_3, window_bounds = array<i64: 128, 128>}, {transform_indices = @transform_4, window_bounds = array<i64: 1, 128>}, {transform_indices = @transform_5, window_bounds = array<i64: 8, 128>}, {transform_indices = @transform_6, window_bounds = array<i64: 8, 128>}]} {
    %c0_i32 = arith.constant 0 : i32
    %0 = arith.cmpi eq, %arg1, %c0_i32 : i32
    %1 = arith.extui %0 : i1 to i32
    %c0_i32_0 = arith.constant 0 : i32
    %2 = arith.cmpi ne, %1, %c0_i32_0 : i32
    scf.if %2 {
      %c0_8 = arith.constant 0 : index
      %c0_9 = arith.constant 0 : index
      %10 = vector.load %arg2[%c0_8, %c0_9] : memref<8x128xf32, #tpu.memory_space<vmem>>, vector<8x128xf32>
      %c0_10 = arith.constant 0 : index
      %c0_11 = arith.constant 0 : index
      %11 = vector.load %arg3[%c0_10, %c0_11] : memref<128x128xf32, #tpu.memory_space<vmem>>, vector<128x128xf32>
      %cst_12 = arith.constant dense<0.000000e+00> : vector<8x128xf32>
      %12 = tpu.matmul %10, %11, %cst_12 {dimension_numbers = #tpu.dot_dimension_numbers<[1], [0], [0], [1], [0, 0, 1, 1], [], []>} : vector<8x128xf32>, vector<128x128xf32>, vector<8x128xf32> -> vector<8x128xf32>
      %c0_13 = arith.constant 0 : index
      %c0_14 = arith.constant 0 : index
      %13 = vector.load %arg4[%c0_13, %c0_14] : memref<1x128xf32, #tpu.memory_space<vmem>>, vector<1x128xf32>
      %14 = vector.broadcast %13 : vector<1x128xf32> to vector<8x128xf32>
      %15 = arith.addf %12, %14 : vector<8x128xf32>
      %c0_15 = arith.constant 0 : index
      %c0_16 = arith.constant 0 : index
      %16 = vector.load %arg7[%c0_15, %c0_16] : memref<8x128xf32, #tpu.memory_space<vmem>>, vector<8x128xf32>
      tpu.vector_store %arg7[%c0_15, %c0_16], %15 {strides = array<i32>} : memref<8x128xf32, #tpu.memory_space<vmem>>, vector<8x128xf32>,
    } else {
    }
    %c0 = arith.constant 0 : index
    %c0_1 = arith.constant 0 : index
    %3 = vector.load %arg7[%c0, %c0_1] : memref<8x128xf32, #tpu.memory_space<vmem>>, vector<8x128xf32>
    %c0_2 = arith.constant 0 : index
    %c0_3 = arith.constant 0 : index
    %4 = vector.load %arg5[%c0_2, %c0_3] : memref<128x128xf32, #tpu.memory_space<vmem>>, vector<128x128xf32>
    %cst = arith.constant dense<0.000000e+00> : vector<8x128xf32>
    %5 = tpu.matmul %3, %4, %cst {dimension_numbers = #tpu.dot_dimension_numbers<[1], [0], [0], [1], [0, 0, 1, 1], [], []>} : vector<8x128xf32>, vector<128x128xf32>, vector<8x128xf32> -> vector<8x128xf32>
    %c0_4 = arith.constant 0 : index
    %c0_5 = arith.constant 0 : index
    %6 = vector.load %arg6[%c0_4, %c0_5] : memref<1x128xf32, #tpu.memory_space<vmem>>, vector<1x128xf32>
    %7 = vector.broadcast %6 : vector<1x128xf32> to vector<8x128xf32>
    %8 = arith.addf %5, %7 : vector<8x128xf32>
    %c0_6 = arith.constant 0 : index
    %c0_7 = arith.constant 0 : index
    %9 = vector.load %arg8[%c0_6, %c0_7] : memref<8x128xf32, #tpu.memory_space<vmem>>, vector<8x128xf32>
    tpu.vector_store %arg8[%c0_6, %c0_7], %8 {strides = array<i32>} : memref<8x128xf32, #tpu.memory_space<vmem>>, vector<8x128xf32>,
    return
  }
  func.func @transform_0(%arg0: i32, %arg1: i32) -> (i32, i32) {
    %c0_i32 = arith.constant 0 : i32
    %c0_i32_0 = arith.constant 0 : i32
    return %arg0, %c0_i32 : i32, i32
  }
  func.func @transform_1(%arg0: i32, %arg1: i32) -> (i32, i32) {
    %c0_i32 = arith.constant 0 : i32
    %c0_i32_0 = arith.constant 0 : i32
    %c0_i32_1 = arith.constant 0 : i32
    return %c0_i32, %c0_i32_0 : i32, i32
  }
  func.func @transform_2(%arg0: i32, %arg1: i32) -> (i32, i32) {
    %c0_i32 = arith.constant 0 : i32
    %c0_i32_0 = arith.constant 0 : i32
    %c0_i32_1 = arith.constant 0 : i32
    return %c0_i32, %c0_i32_0 : i32, i32
  }
  func.func @transform_3(%arg0: i32, %arg1: i32) -> (i32, i32) {
    %c0_i32 = arith.constant 0 : i32
    %c0_i32_0 = arith.constant 0 : i32
    return %c0_i32, %arg1 : i32, i32
  }
  func.func @transform_4(%arg0: i32, %arg1: i32) -> (i32, i32) {
    %c0_i32 = arith.constant 0 : i32
    %c0_i32_0 = arith.constant 0 : i32
    return %c0_i32, %arg1 : i32, i32
  }
  func.func @transform_5(%arg0: i32, %arg1: i32) -> (i32, i32) {
    %c0_i32 = arith.constant 0 : i32
    %c0_i32_0 = arith.constant 0 : i32
    return %arg0, %c0_i32 : i32, i32
  }
  func.func @transform_6(%arg0: i32, %arg1: i32) -> (i32, i32) {
    %c0_i32 = arith.constant 0 : i32
    return %arg0, %arg1 : i32, i32
  }
}

</mosaic_0001>

<bundles_post_ra>
// kernel: tpu_custom_call.1
= control target key start
LH: loop header
LB: loop body
LE: loop exit
PB: predicated region body
PF: predicated region fallthrough
CT: control target
= control target key end

     0   :  { %12 = vsyncpa [#allocation3], 0  ;;  %s788_s0 = inlined_call_operand.hbm [shape: f32[8,128], index: 0, kind: input, shape index: {}]   ;;  %s789_s1 = inlined_call_operand.hbm [shape: f32[128,128], index: 1, kind: input, shape index: {}]   ;;  %s790_s2 = inlined_call_operand.hbm [shape: f32[1,128], index: 2, kind: input, shape index: {}]   ;;  %s791_s3 = inlined_call_operand.hbm [shape: f32[128,128], index: 3, kind: input, shape index: {}]   ;;  %s792_s4 = inlined_call_operand.hbm [shape: f32[1,128], index: 4, kind: input, shape index: {}]   ;;  %s793_s5 = inlined_call_operand.hbm [shape: f32[8,128], index: 5, kind: output, shape index: {0}]   ;;  %s794_s6 = inlined_call_operand.hbm [shape: f32[8,128], index: 6, kind: output, shape index: {1}]  }
   0x1   :  { %13 = vsyncpa [#allocation6], 0 }
   0x2   :  { %14 = vsyncpa [#allocation9], 0 }
   0x3   :  { %15 = vsyncpa [#allocation4], 0 }
   0x4   :  { %16 = vsyncpa [#allocation13], 0  ;;  %s641_s21 = smov [#allocation5]   ;;  %s477_s25 = scalar_lea.hbm %s789_s1, 2048 }
   0x5   :  { %s32_s22 = sshll.u32 %s641_s21, 4  ;;  %p478_p0 = scmp.ne.s32.totalorder %s789_s1, %s477_s25  ;;  %s33_s22 = int_to_ptr.vmem [resolvable:$true] %s32_s22 }
   0x6   :  { %p481_p1 = scmp.lt.u32.totalorder %s477_s25, %s789_s1 }
   0x8   :  { %p483_p2 = pnand %p481_p1, %p478_p0 }
   0xa   :  { %486 = shalt.err (!%p483_p2)
}
   0xb   :  { %s487_s30 = scalar_lea.vmem %s33_s22, 2048  ;;  %p492_p4 = scmp.lt.s32.totalorder %s33_s22, %s33_s22 }
   0xc   :  { %p488_p3 = scmp.ne.s32.totalorder %s33_s22, %s487_s30  ;;  %p493_p5 = scmp.lt.s32.totalorder %s487_s30, %s487_s30 }
   0xe   :  { %p494_p6 = por %p493_p5, %p492_p4 }
  0x10   :  { %p495_p7 = pnand %p494_p6, %p488_p3 }
  0x12   :  { %498 = shalt.err (!%p495_p7)
}
  0x13   :  { %s642_s7 = smov 128   ;;  %s643_s8 = smov 8  }
  0x14   :  { %38 = dma.hbm_to_vmem [thread:$0]  %s789_s1, 2048, %s33_s22, [#allocation6], %s642_s7, %s642_s7, %s643_s8  }
  0x15   :  { %s644_s11 = smov [#allocation8]   ;;  %s645_s13 = smov [#allocation2]  }
  0x16   :  { %s54_s12 = sshll.u32 %s644_s11, 4  ;;  %s23_s14 = sshll.u32 %s645_s13, 4  ;;  %s55_s12 = int_to_ptr.vmem [resolvable:$true] %s54_s12  ;;  %s24_s14 = int_to_ptr.vmem [resolvable:$true] %s23_s14 }
  0x17   :  { %s499_s17 = scalar_lea.hbm %s791_s3, 2048 }
  0x18   :  { %p500_p8 = scmp.ne.s32.totalorder %s791_s3, %s499_s17  ;;  %p503_p9 = scmp.lt.u32.totalorder %s499_s17, %s791_s3 }
  0x1a   :  { %p505_p10 = pnand %p503_p9, %p500_p8 }
  0x1c   :  { %508 = shalt.err (!%p505_p10)
}
  0x1d   :  { %s509_s1 = scalar_lea.vmem %s55_s12, 2048  ;;  %p514_p12 = scmp.lt.s32.totalorder %s55_s12, %s55_s12 }
  0x1e   :  { %p510_p11 = scmp.ne.s32.totalorder %s55_s12, %s509_s1  ;;  %p515_p13 = scmp.lt.s32.totalorder %s509_s1, %s509_s1 }
  0x20   :  { %p516_p0 = por %p515_p13, %p514_p12 }
  0x22   :  { %p517_p1 = pnand %p516_p0, %p510_p11 }
  0x24   :  { %520 = shalt.err (!%p517_p1)
}
  0x25   :  { %60 = dma.hbm_to_vmem [thread:$0]  %s791_s3, 2048, %s55_s12, [#allocation9], %s642_s7, %s642_s7, %s643_s8  }
  0x26   :  { %s521_s26 = scalar_lea.hbm %s788_s0, 128 }
  0x27   :  { %p522_p2 = scmp.ne.s32.totalorder %s788_s0, %s521_s26  ;;  %p525_p3 = scmp.lt.u32.totalorder %s521_s26, %s788_s0 }
  0x29   :  { %p527_p4 = pnand %p525_p3, %p522_p2 }
  0x2b   :  { %530 = shalt.err (!%p527_p4)
}
  0x2c   :  { %s531_s9 = scalar_lea.vmem %s24_s14, 128  ;;  %p536_p6 = scmp.lt.s32.totalorder %s24_s14, %s24_s14 }
  0x2d   :  { %p532_p5 = scmp.ne.s32.totalorder %s24_s14, %s531_s9  ;;  %p537_p7 = scmp.lt.s32.totalorder %s531_s9, %s531_s9 }
  0x2f   :  { %p538_p8 = por %p537_p7, %p536_p6 }
  0x31   :  { %p539_p9 = pnand %p538_p8, %p532_p5 }
  0x33   :  { %542 = shalt.err (!%p539_p9)
}
  0x34   :  { %26 = dma.hbm_to_vmem [thread:$0]  %s788_s0, 128, %s24_s14, [#allocation3]  }
  0x35   :  { %s646_s8 = smov [#allocation7]   ;;  %s647_s11 = smov [#allocation10]  }
  0x36   :  { %s45_s10 = sshll.u32 %s646_s8, 4  ;;  %s67_s12 = sshll.u32 %s647_s11, 4  ;;  %s46_s10 = int_to_ptr.vmem [resolvable:$true] %s45_s10  ;;  %s68_s12 = int_to_ptr.vmem [resolvable:$true] %s67_s12 }
  0x37   :  { %s543_s16 = scalar_lea.hbm %s790_s2, 16 }
  0x38   :  { %p544_p10 = scmp.ne.s32.totalorder %s790_s2, %s543_s16  ;;  %p547_p11 = scmp.lt.u32.totalorder %s543_s16, %s790_s2 }
  0x3a   :  { %p549_p12 = pnand %p547_p11, %p544_p10 }
  0x3c   :  { %552 = shalt.err (!%p549_p12)
}
  0x3d   :  { %s553_s0 = scalar_lea.vmem %s46_s10, 16  ;;  %s557_s14 = scalar_lea.vmem %s46_s10, 32 }
  0x3e   :  { %p554_p13 = scmp.ne.s32.totalorder %s46_s10, %s553_s0  ;;  %p558_p0 = scmp.lt.s32.totalorder %s46_s10, %s46_s10 }
  0x3f   :  { %p559_p1 = scmp.lt.s32.totalorder %s557_s14, %s553_s0 }
  0x41   :  { %p560_p2 = por %p559_p1, %p558_p0 }
  0x43   :  { %p561_p3 = pnand %p560_p2, %p554_p13 }
  0x45   :  { %564 = shalt.err (!%p561_p3)
}
  0x46   :  { %48 = dma.hbm_to_vmem [thread:$0]  %s790_s2, 16, %s46_s10, [#allocation6]  }
  0x47   :  { %s565_s24 = scalar_lea.hbm %s792_s4, 16 }
  0x48   :  { %p566_p4 = scmp.ne.s32.totalorder %s792_s4, %s565_s24  ;;  %p569_p5 = scmp.lt.u32.totalorder %s565_s24, %s792_s4 }
  0x4a   :  { %p571_p6 = pnand %p569_p5, %p566_p4 }
  0x4c   :  { %574 = shalt.err (!%p571_p6)
}
  0x4d   :  { %s575_s29 = scalar_lea.vmem %s68_s12, 16  ;;  %s579_s30 = scalar_lea.vmem %s68_s12, 32 }
  0x4e   :  { %p576_p7 = scmp.ne.s32.totalorder %s68_s12, %s575_s29  ;;  %p580_p8 = scmp.lt.s32.totalorder %s68_s12, %s68_s12 }
  0x4f   :  { %p581_p9 = scmp.lt.s32.totalorder %s579_s30, %s575_s29 }
  0x51   :  { %p582_p10 = por %p581_p9, %p580_p8 }
  0x53   :  { %p583_p11 = pnand %p582_p10, %p576_p7 }
  0x55   :  { %586 = shalt.err (!%p583_p11)
}
  0x56   :  { %70 = dma.hbm_to_vmem [thread:$0]  %s792_s4, 16, %s68_s12, [#allocation9]  }
  0x57   :  { %631 = dma.done.wait [#allocation3], 128  }
  0x58   :  { %632 = vsyncadd [#allocation3], 4294967168 }
  0x59   :  { %633 = dma.done.wait [#allocation6], 2064  }
  0x5a   :  { %634 = vsyncadd [#allocation6], 4294965232 }
  0x5b   :  { %635 = dma.done.wait [#allocation9], 2064  }
  0x5c   :  { %636 = vsyncadd [#allocation9], 4294965232  ;;  %v648_v0 = vmov 0.0|0.0   ;;  %vm649_vm0 = vmmov 0   ;;  %v650_v1 = vmov 0.0   ;;  %v91_v2 = vld [vmem:[#allocation5] sm:$0xff] }
  0x5d   :  { %417 = vmatprep.subr.bf16.mxu0 %v648_v0  ;;  %379 = vmatprep.mubr.msk.f32.mxu0 %vm649_vm0, %v650_v1  ;;  %v92_v3 = vld [vmem:[#allocation5 + $0x8] sm:$0xff]  ;;  %v93_v4 = vld [vmem:[#allocation5 + $0x10] sm:$0xff]  ;;  %v94_v6 = vld [vmem:[#allocation5 + $0x18] sm:$0xff]  ;;  %s651_s4 = smov [#allocation11]  }
  0x5e   :  { %441 = vmatprep.subr.bf16.mxu1 %v648_v0  ;;  %414 = vmatprep.mubr.msk.f32.mxu1 %vm649_vm0, %v650_v1  ;;  %v418_v5 = vpack.c.bf16 %v92_v3, %v91_v2  ;;  %v421_v7 = vpack.c.bf16 %v94_v6, %v93_v4  ;;  %v95_v8 = vld [vmem:[#allocation5 + $0x20] sm:$0xff]  ;;  %v96_v9 = vld [vmem:[#allocation5 + $0x28] sm:$0xff]  ;;  %v188_v12 = vld [vmem:[#allocation8 + $0x10] sm:$0xff]  ;;  %s286_s3 = sshll.u32 %s651_s4, 4  ;;  %s287_s3 = int_to_ptr.vmem [resolvable:$true] %s286_s3 }
  0x5f   :  { %v186_v10 = vld [vmem:[#allocation8] sm:$0xff]  ;;  %v187_v11 = vld [vmem:[#allocation8 + $0x8] sm:$0xff]  ;;  %v189_v13 = vld [vmem:[#allocation8 + $0x18] sm:$0xff]  ;;  %v424_v14 = vpack.c.bf16 %v96_v9, %v95_v8  ;;  %s587_s7 = scalar_lea.vmem %s287_s3, 128  ;;  %p592_p13 = scmp.lt.s32.totalorder %s287_s3, %s287_s3 }
  0x60   :  { %419 = vmatpush3.bf16.msra.mxu0 %v418_v5  ;;  %v442_v15 = vpack.c.bf16 %v187_v11, %v186_v10  ;;  %v97_v16 = vld [vmem:[#allocation5 + $0x30] sm:$0xff]  ;;  %v98_v17 = vld [vmem:[#allocation5 + $0x38] sm:$0xff]  ;;  %v445_v18 = vpack.c.bf16 %v189_v13, %v188_v12  ;;  %v190_v19 = vld [vmem:[#allocation8 + $0x20] sm:$0xff]  ;;  %p588_p12 = scmp.ne.s32.totalorder %s287_s3, %s587_s7  ;;  %p593_p0 = scmp.lt.s32.totalorder %s587_s7, %s587_s7 }
  0x61   :  { %420 = vmatprep.subr.bf16.mxu0 %v648_v0  ;;  %v191_v20 = vld [vmem:[#allocation8 + $0x28] sm:$0xff]  ;;  %v427_v21 = vpack.c.bf16 %v98_v17, %v97_v16  ;;  %v99_v22 = vld [vmem:[#allocation5 + $0x40] sm:$0xff]  ;;  %v192_v25 = vld [vmem:[#allocation8 + $0x30] sm:$0xff] }
  0x62   :  { %443 = vmatpush3.bf16.msra.mxu1 %v442_v15  ;;  %v100_v23 = vld [vmem:[#allocation5 + $0x48] sm:$0xff]  ;;  %v448_v24 = vpack.c.bf16 %v191_v20, %v190_v19  ;;  %v193_v26 = vld [vmem:[#allocation8 + $0x38] sm:$0xff]  ;;  %v101_v28 = vld [vmem:[#allocation5 + $0x50] sm:$0xff]  ;;  %p594_p1 = por %p593_p0, %p592_p13 }
  0x63   :  { %444 = vmatprep.subr.bf16.mxu1 %v648_v0  ;;  %v430_v27 = vpack.c.bf16 %v100_v23, %v99_v22  ;;  %v102_v29 = vld [vmem:[#allocation5 + $0x58] sm:$0xff]  ;;  %v451_v30 = vpack.c.bf16 %v193_v26, %v192_v25  ;;  %v194_v31 = vld [vmem:[#allocation8 + $0x40] sm:$0xff]  ;;  %v195_v32 = vld [vmem:[#allocation8 + $0x48] sm:$0xff] }
  0x64   :  { %422 = vmatpush3.bf16.msra.mxu0 %v421_v7  ;;  %v433_v33 = vpack.c.bf16 %v102_v29, %v101_v28  ;;  %v103_v34 = vld [vmem:[#allocation5 + $0x60] sm:$0xff]  ;;  %v104_v35 = vld [vmem:[#allocation5 + $0x68] sm:$0xff]  ;;  %v454_v36 = vpack.c.bf16 %v195_v32, %v194_v31  ;;  %v105_v38 = vld [vmem:[#allocation5 + $0x70] sm:$0xff]  ;;  %p595_p2 = pnand %p594_p1, %p588_p12 }
  0x65   :  { %423 = vmatprep.subr.bf16.mxu0 %v648_v0  ;;  %v436_v37 = vpack.c.bf16 %v104_v35, %v103_v34  ;;  %v106_v39 = vld [vmem:[#allocation5 + $0x78] sm:$0xff]  ;;  %v198_v45 = vld [vmem:[#allocation8 + $0x60] sm:$0xff]  ;;  %v199_v46 = vld [vmem:[#allocation8 + $0x68] sm:$0xff] }
  0x66   :  { %446 = vmatpush3.bf16.msra.mxu1 %v445_v18  ;;  %v439_v40 = vpack.c.bf16 %v106_v39, %v105_v38  ;;  %v90_v41 = vld [vmem:[#allocation2] sm:$0xff]  ;;  %v460_v47 = vpack.c.bf16 %v199_v46, %v198_v45  ;;  %v311_v51 = vld [vmem:[#allocation7] ss:$0 sm:$0xff] }
  0x67   :  { %447 = vmatprep.subr.bf16.mxu1 %v648_v0  ;;  %v196_v42 = vld [vmem:[#allocation8 + $0x50] sm:$0xff]  ;;  %v197_v43 = vld [vmem:[#allocation8 + $0x58] sm:$0xff] }
  0x68   :  { %425 = vmatpush3.bf16.msra.mxu0 %v424_v14  ;;  %v457_v44 = vpack.c.bf16 %v197_v43, %v196_v42  ;;  %v200_v48 = vld [vmem:[#allocation8 + $0x70] sm:$0xff]  ;;  %v201_v49 = vld [vmem:[#allocation8 + $0x78] sm:$0xff] }
  0x69   :  { %426 = vmatprep.subr.bf16.mxu0 %v648_v0  ;;  %v463_v50 = vpack.c.bf16 %v201_v49, %v200_v48 }
  0x6a   :  { %449 = vmatpush3.bf16.msra.mxu1 %v448_v24 }
  0x6b   :  { %450 = vmatprep.subr.bf16.mxu1 %v648_v0 }
  0x6c   :  { %428 = vmatpush3.bf16.msra.mxu0 %v427_v21 }
  0x6d   :  { %429 = vmatprep.subr.bf16.mxu0 %v648_v0 }
  0x6e   :  { %452 = vmatpush3.bf16.msra.mxu1 %v451_v30 }
  0x6f   :  { %453 = vmatprep.subr.bf16.mxu1 %v648_v0 }
  0x70   :  { %431 = vmatpush3.bf16.msra.mxu0 %v430_v27 }
  0x71   :  { %432 = vmatprep.subr.bf16.mxu0 %v648_v0 }
  0x72   :  { %455 = vmatpush3.bf16.msra.mxu1 %v454_v36 }
  0x73   :  { %456 = vmatprep.subr.bf16.mxu1 %v648_v0 }
  0x74   :  { %434 = vmatpush3.bf16.msra.mxu0 %v433_v33 }
  0x75   :  { %435 = vmatprep.subr.bf16.mxu0 %v648_v0 }
  0x76   :  { %458 = vmatpush3.bf16.msra.mxu1 %v457_v44 }
  0x77   :  { %459 = vmatprep.subr.bf16.mxu1 %v648_v0 }
  0x78   :  { %437 = vmatpush3.bf16.msra.mxu0 %v436_v37 }
  0x79   :  { %438 = vmatprep.subr.bf16.mxu0 %v648_v0 }
  0x7a   :  { %461 = vmatpush3.bf16.msra.mxu1 %v460_v47 }
  0x7b   :  { %462 = vmatprep.subr.bf16.mxu1 %v648_v0 }
  0x7c   :  { %440 = vmatpush3.bf16.msra.mxu0 %v439_v40 }
  0x7e   :  { %464 = vmatpush3.bf16.msra.mxu1 %v463_v50 }
  0x7f   :  { %380 = vmatmul.mubr.f32.vlgmr.msra.gmra.mrb[0].mxu0 %v90_v41 }
 0x152   :  { %v180_v52 = vpop.f32.mrb[0].mxu0 }
 0x153   :  { %v181_v53 = vadd.f32 %v311_v51, %v180_v52  ;;  %v381_v54 = vpop.f32.mrb[1].mxu0 }
 0x155   :  { %184 = vst [vmem:[#allocation11] sm:$0xff] %v181_v53  ;;  %415 = vmatmul.mubr.f32.vlgmr.msra.gmra.mrb[0].mxu1 %v181_v53 }
 0x156   :  { %598 = shalt.err (!%p595_p2)
}
 0x157   :  { %s599_s11 = scalar_lea.hbm %s793_s5, 128 }
 0x158   :  { %p600_p3 = scmp.ne.s32.totalorder %s793_s5, %s599_s11  ;;  %p603_p4 = scmp.lt.u32.totalorder %s599_s11, %s793_s5 }
 0x15a   :  { %p605_p5 = pnand %p603_p4, %p600_p3 }
 0x15c   :  { %608 = shalt.err (!%p605_p5)
}
 0x15d   :  { %289 = dma.vmem_to_hbm [thread:$0]  %s287_s3, 128, %s793_s5, [#allocation4]   ;;  %v312_v55 = vld [vmem:[#allocation10] ss:$0 sm:$0xff] }
 0x15e   :  { %s652_s19 = smov [#allocation12]  }
 0x15f   :  { %s296_s20 = sshll.u32 %s652_s19, 4  ;;  %s297_s20 = int_to_ptr.vmem [resolvable:$true] %s296_s20 }
 0x160   :  { %s609_s0 = scalar_lea.vmem %s297_s20, 128  ;;  %p614_p7 = scmp.lt.s32.totalorder %s297_s20, %s297_s20 }
 0x161   :  { %p610_p6 = scmp.ne.s32.totalorder %s297_s20, %s609_s0  ;;  %p615_p8 = scmp.lt.s32.totalorder %s609_s0, %s609_s0 }
 0x163   :  { %p616_p9 = por %p615_p8, %p614_p7 }
 0x165   :  { %p617_p10 = pnand %p616_p9, %p610_p6 }
 0x228   :  { %v275_v56 = vpop.f32.mrb[0].mxu1 }
 0x229   :  { %v276_v57 = vadd.f32 %v312_v55, %v275_v56  ;;  %v416_v58 = vpop.f32.mrb[1].mxu1 }
 0x22b   :  { %279 = vst [vmem:[#allocation12] sm:$0xff] %v276_v57 }
 0x22c   :  { %620 = shalt.err (!%p617_p10)
}
 0x22d   :  { %s621_s1 = scalar_lea.hbm %s794_s6, 128 }
 0x22e   :  { %p622_p11 = scmp.ne.s32.totalorder %s794_s6, %s621_s1  ;;  %p625_p12 = scmp.lt.u32.totalorder %s621_s1, %s794_s6 }
 0x230   :  { %p627_p13 = pnand %p625_p12, %p622_p11 }
 0x232   :  { %630 = shalt.err (!%p627_p13)
}
 0x233   :  { %299 = dma.vmem_to_hbm [thread:$0]  %s297_s20, 128, %s794_s6, [#allocation13]  }
 0x234   :  { %637 = dma.done.wait [#allocation4], 128  }
 0x235   :  { %638 = vsyncadd [#allocation4], 4294967168 }
 0x236   :  { %639 = dma.done.wait [#allocation13], 128  }
 0x237   :  { %640 = vsyncadd [#allocation13], 4294967168 }
 0x238   :  { %306 = vsyncpa [#allocation3], 1 }
 0x239   :  { %307 = vsyncpa [#allocation6], 1 }
 0x23a   :  { %308 = vsyncpa [#allocation9], 1 }
 0x23b   :  { %309 = vsyncpa [#allocation4], 1 }
 0x23c   :  { %310 = vsyncpa [#allocation13], 1 }

</bundles_post_ra>
